<compile_context>
chip_gen: v7x
topology: tpu7x:2x2x1
jax: 0.10.0
libtpu: 0.0.40
codegen_flags: <defaults>
</compile_context>

<pallas_src>
import math
from functools import partial

import jax
import jax.numpy as jnp
from jax.experimental import pallas as pl
from jax.experimental.pallas import tpu as pltpu

_INV_SQRT2 = 1.0 / math.sqrt(2.0)


# ---------------------------------------------------------------------------
# Kernels
# ---------------------------------------------------------------------------
def _gelu_exact(h):
    # Exact (erf-based) GELU in f32 -- matches nn.GELU()'s default.
    return 0.5 * h * (1.0 + jax.lax.erf(h * _INV_SQRT2))


def mlp_kernel_resident(x_ref, wfc_ref, bfc_ref, wproj_ref, bproj_ref, o_ref):
    """Both weight matrices resident in VMEM; one fused pass per row tile."""
    h = jnp.dot(x_ref[...], wfc_ref[...], preferred_element_type=jnp.float32)
    g = _gelu_exact(h + bfc_ref[...])
    o = jnp.dot(g.astype(wproj_ref.dtype), wproj_ref[...],
                preferred_element_type=jnp.float32)
    o_ref[...] = (o + bproj_ref[...]).astype(o_ref.dtype)


def mlp_kernel_stream(x_ref, wfc_ref, bfc_ref, wproj_ref, bproj_ref, o_ref,
                      acc_ref):
    """Hidden axis tiled; weight slabs streamed, projection accumulated in f32."""
    j = pl.program_id(1)

    @pl.when(j == 0)
    def _():
        acc_ref[...] = jnp.zeros_like(acc_ref)

    # c_fc slab: x @ Wfc[:, j-block] + bfc[j-block]   (MXU, f32 accumulate)
    h = jnp.dot(x_ref[...], wfc_ref[...], preferred_element_type=jnp.float32)
    g = _gelu_exact(h + bfc_ref[...])

    # partial c_proj: accumulate g_j @ Wproj[j-block, :] into the f32 scratch
    acc_ref[...] += jnp.dot(g.astype(wproj_ref.dtype), wproj_ref[...],
                            preferred_element_type=jnp.float32)

    @pl.when(j == pl.num_programs(1) - 1)
    def _():
        o_ref[...] = (acc_ref[...] + bproj_ref[...]).astype(o_ref.dtype)


# ---------------------------------------------------------------------------
# Planning helpers
# ---------------------------------------------------------------------------
def _round_up(x, m):
    return ((x + m - 1) // m) * m


def _vmem_capacity_bytes():
    """Physical VMEM per core (128 MiB v5e/v6e, 64 MiB v7x); safe fallback."""
    try:
        cap = int(pltpu.get_tpu_info().vmem_capacity_bytes)
        if cap > 0:
            return cap
    except Exception:
        pass
    return 64 * 1024 * 1024  # conservative (v7x-sized) fallback


def _spec(shape, index_map, *, single_buffer=False):
    """BlockSpec; optionally single-buffered for constant / slow-varying blocks."""
    if single_buffer:
        try:
            return pl.BlockSpec(shape, index_map, pipeline_mode=pl.Buffered(1))
        except Exception:  # API without pipeline_mode: fall back (plan allows it)
            pass
    return pl.BlockSpec(shape, index_map)


def _plan(M, W, H, isz, osz, budget, force_stream, tm_req, th_req):
    """Return (mode, tm, th).  All trace-time Python; conservative budgets."""
    m8 = _round_up(max(M, 1), 8)

    def clamp_tm(tm):
        tm = (int(tm) // 8) * 8
        return max(8, min(tm, 1024, m8))

    # ---- weights-resident fast path (weights DMA'd exactly once) ----------
    if not force_stream:
        # Budget weights at 2x so the plan stays legal even if Buffered(1)
        # falls back to default double buffering.
        wres = 2 * (2 * W * H * isz + (H + W) * 4)
        if wres <= 0.55 * budget:
            # remaining VMEM: x/out tiles (double buffered) + f32 intermediates
            per_row = 2 * W * isz + 2 * W * osz + 12 * H
            tm = clamp_tm(tm_req if tm_req is not None
                          else (budget - wres) // per_row)
            return "resident", tm, H

    # ---- hidden-tiled streaming path --------------------------------------
    if th_req is not None:
        th = th_req
        assert H % th == 0, "hidden dim must divide the hidden tile"
    else:
        th = None
        for cand in (1024, 512, 256, 128):
            # double-buffered W_fc + W_proj slabs must not eat the tm budget
            if H % cand == 0 and 4 * W * cand * isz <= 0.40 * budget:
                th = cand
                break
        if th is None:
            th = H
            while (4 * W * th * isz > 0.40 * budget and th % 2 == 0
                   and th > 128):
                th //= 2
    slab = 4 * W * th * isz + 4 * (th + W) * 4
    per_row = 2 * W * isz + 2 * W * osz + 4 * W + 12 * th
    tm = clamp_tm(tm_req if tm_req is not None
                  else (budget - slab) // per_row)
    return "stream", tm, th


# ---------------------------------------------------------------------------
# Public wrapper
# ---------------------------------------------------------------------------
@partial(jax.jit,
         static_argnames=("compute_dtype", "tm", "th", "force_stream"))
def mlp_pallas(x, w_fc, b_fc, w_proj, b_proj, *, compute_dtype=None,
               tm=None, th=None, force_stream=False):
    """Fused MLP: c_proj(GELU(c_fc(x))).

    x: [..., W]; w_fc: [W, 4W]; b_fc: [4W]; w_proj: [4W, W]; b_proj: [W].
    Weights are stored [in, out] (pre-transposed vs torch's [out, in]).

    compute_dtype: dtype fed to the MXU (bf16 recommended on all current TPUs);
    accumulation, GELU and bias adds are always f32; output follows x.dtype.
    Pre-cast weights to compute_dtype at the caller so the astype below is a
    no-op (avoids a full f32->bf16 weight copy in HBM on every call).
    """
    orig_shape = x.shape
    W = x.shape[-1]
    M = int(math.prod(x.shape[:-1]))
    H = w_fc.shape[1]
    out_dtype = x.dtype
    cd = (jnp.dtype(compute_dtype) if compute_dtype is not None
          else jnp.dtype(x.dtype))
    isz = cd.itemsize
    osz = jnp.dtype(out_dtype).itemsize

    cap = _vmem_capacity_bytes()
    plan_budget = int(cap * 0.75)        # what the tile planner may consume
    vmem_limit = int(cap * 0.90)         # Mosaic limit; headroom above the plan

    mode, tm_eff, th_eff = _plan(M, W, H, isz, osz, plan_budget,
                                 force_stream, tm, th)

    # v7x megacore balance: prefer an even number of row tiles when M spans >1.
    n_row = -(-M // tm_eff)
    if n_row > 1 and n_row % 2 == 1:
        tm_eff = max(8, _round_up(-(-M // (n_row + 1)), 8))

    m_pad = _round_up(M, tm_eff)

    x2 = x.reshape(M, W).astype(cd)
    if m_pad != M:
        # TODO(synk): masked tail block instead of this HBM round trip for
        # ragged M; it is a no-op whenever M is a multiple of the row tile.
        x2 = jnp.pad(x2, ((0, m_pad - M), (0, 0)))

    wfc = w_fc.astype(cd)        # no-ops when the caller pre-casts the params
    wproj = w_proj.astype(cd)
    bfc2 = b_fc.reshape(1, H).astype(jnp.float32)
    bproj2 = b_proj.reshape(1, W).astype(jnp.float32)

    flops = 4 * m_pad * W * H            # two matmuls, 2 flops/MAC
    transcendentals = m_pad * H          # one erf per hidden element

    if mode == "resident":
        grid = (m_pad // tm_eff,)
        in_specs = [
            _spec((tm_eff, W), lambda i: (i, 0)),                        # x
            _spec((W, H), lambda i: (0, 0), single_buffer=True),         # W_fc
            _spec((1, H), lambda i: (0, 0), single_buffer=True),         # b_fc
            _spec((H, W), lambda i: (0, 0), single_buffer=True),         # W_proj
            _spec((1, W), lambda i: (0, 0), single_buffer=True),         # b_proj
        ]
        out_specs = pl.BlockSpec((tm_eff, W), lambda i: (i, 0))
        scratch_shapes = []
        kernel = mlp_kernel_resident
        dim_sem = ("parallel",)
        bytes_accessed = (m_pad * W * (isz + osz)
                          + 2 * W * H * isz + (H + W) * 4)
    else:
        grid = (m_pad // tm_eff, H // th_eff)
        in_specs = [
            _spec((tm_eff, W), lambda i, j: (i, 0), single_buffer=True),  # x
            _spec((W, th_eff), lambda i, j: (0, j)),                      # W_fc
            _spec((1, th_eff), lambda i, j: (0, j)),                      # b_fc
            _spec((th_eff, W), lambda i, j: (j, 0)),                      # W_proj
            _spec((1, W), lambda i, j: (0, 0), single_buffer=True),       # b_proj
        ]
        out_specs = pl.BlockSpec((tm_eff, W), lambda i, j: (i, 0))
        scratch_shapes = [pltpu.VMEM((tm_eff, W), jnp.float32)]
        kernel = mlp_kernel_stream
        dim_sem = ("parallel", "arbitrary")
        bytes_accessed = (m_pad * W * (isz + osz)
                          + (m_pad // tm_eff) * (2 * W * H * isz
                                                 + (H + W) * 4))

    out = pl.pallas_call(
        kernel,
        out_shape=jax.ShapeDtypeStruct((m_pad, W), out_dtype),
        grid_spec=pltpu.PrefetchScalarGridSpec(
            num_scalar_prefetch=0,
            grid=grid,
            in_specs=in_specs,
            out_specs=out_specs,
            scratch_shapes=scratch_shapes,
        ),
        compiler_params=pltpu.CompilerParams(
            dimension_semantics=dim_sem,
            vmem_limit_bytes=vmem_limit,
        ),
        cost_estimate=pl.CostEstimate(
            flops=int(flops),
            transcendentals=int(transcendentals),
            bytes_accessed=int(bytes_accessed),
        ),
    )(x2, wfc, bfc2, wproj, bproj2)

    if m_pad != M:
        out = out[:M]
    return out.reshape(orig_shape)


# ---------------------------------------------------------------------------
# Parameter init / pure-JAX reference
# ---------------------------------------------------------------------------
def init_mlp_params(key, width, dtype=jnp.float32):
    """nn.Linear-style init (uniform +/- 1/sqrt(fan_in)); weights stored [in, out]."""
    hidden = 4 * width
    k1, k2, k3, k4 = jax.random.split(key, 4)
    lim_fc = 1.0 / math.sqrt(width)
    lim_proj = 1.0 / math.sqrt(hidden)
    w_fc = jax.random.uniform(k1, (width, hidden), dtype, -lim_fc, lim_fc)
    b_fc = jax.random.uniform(k2, (hidden,), dtype, -lim_fc, lim_fc)
    w_proj = jax.random.uniform(k3, (hidden, width), dtype, -lim_proj, lim_proj)
    b_proj = jax.random.uniform(k4, (width,), dtype, -lim_proj, lim_proj)
    return w_fc, b_fc, w_proj, b_proj


def mlp_reference(x, w_fc, b_fc, w_proj, b_proj, compute_dtype=None):
    """Pure-JAX reference with the same operand-dtype policy as the kernel."""
    cd = (jnp.dtype(compute_dtype) if compute_dtype is not None
          else jnp.dtype(x.dtype))
    h = jnp.dot(x.astype(cd), w_fc.astype(cd),
                preferred_element_type=jnp.float32) + b_fc.astype(jnp.float32)
    g = 0.5 * h * (1.0 + jax.lax.erf(h * _INV_SQRT2))
    o = jnp.dot(g.astype(cd), w_proj.astype(cd),
                preferred_element_type=jnp.float32) + b_proj.astype(jnp.float32)
    return o.astype(x.dtype)


# ---------------------------------------------------------------------------
# Demo / self-test
# ---------------------------------------------------------------------------
if __name__ == "__main__":
    # Small, lane-dense demo: width=128 -> ffn hidden=512, 16 tokens.
    B, S, W = 2, 8, 128
    key = jax.random.PRNGKey(0)
    kx, kp = jax.random.split(key)

    x = jax.random.normal(kx, (B, S, W), dtype=jnp.float32)
    w_fc, b_fc, w_proj, b_proj = init_mlp_params(kp, W)

    # 1) f32 operands (exact semantics of the torch module); weights-resident path.
    y32 = jax.block_until_ready(
        mlp_pallas(x, w_fc, b_fc, w_proj, b_proj, compute_dtype=jnp.float32))
    y32_ref = mlp_reference(x, w_fc, b_fc, w_proj, b_proj, jnp.float32)
    assert y32.shape == (B, S, W)
    assert jnp.allclose(y32, y32_ref, atol=1e-4, rtol=1e-4), "f32 mismatch"

    # 2) bf16-operand / f32-accumulate fast path with pre-cast weights
    #    (recommended deployment configuration on v5e/v6e/v7x).
    wfc_bf = w_fc.astype(jnp.bfloat16)
    wproj_bf = w_proj.astype(jnp.bfloat16)
    ybf = jax.block_until_ready(
        mlp_pallas(x, wfc_bf, b_fc, wproj_bf, b_proj,
                   compute_dtype=jnp.bfloat16))
    ybf_ref = mlp_reference(x, wfc_bf, b_fc, wproj_bf, b_proj, jnp.bfloat16)
    assert ybf.shape == (B, S, W)
    assert jnp.allclose(ybf, ybf_ref, atol=2e-2, rtol=2e-2), "bf16 mismatch"

    # 3) Force the hidden-tiled streaming path (used for large widths) so both
    #    execution modes are exercised and kept correct.
    yst = jax.block_until_ready(
        mlp_pallas(x, w_fc, b_fc, w_proj, b_proj, compute_dtype=jnp.float32,
                   force_stream=True, th=128))
    assert jnp.allclose(yst, y32_ref, atol=1e-4, rtol=1e-4), "stream mismatch"

    print("KERNEL_OK")
</pallas_src>

<mosaic_0001>
module attributes {stable_mosaic.version = 11 : i64} {
  func.func @mlp_kernel_resident(%arg0: i32, %arg1: memref<16x128xf32, #tpu.memory_space<vmem>>, %arg2: memref<128x512xf32, #tpu.memory_space<vmem>>, %arg3: memref<1x512xf32, #tpu.memory_space<vmem>>, %arg4: memref<512x128xf32, #tpu.memory_space<vmem>>, %arg5: memref<1x128xf32, #tpu.memory_space<vmem>>, %arg6: memref<16x128xf32, #tpu.memory_space<vmem>>) attributes {dimension_semantics = [#tpu.dimension_semantics<parallel>], iteration_bounds = array<i64: 1>, scalar_prefetch = 0 : i64, scratch_operands = 0 : i64, tpu.core_type = #tpu.core_type<tc>, window_params = [{transform_indices = @transform_0, window_bounds = array<i64: 16, 128>}, {pipeline_mode = #tpu.pipeline_mode<synchronous>, transform_indices = @transform_1, window_bounds = array<i64: 128, 512>}, {pipeline_mode = #tpu.pipeline_mode<synchronous>, transform_indices = @transform_2, window_bounds = array<i64: 1, 512>}, {pipeline_mode = #tpu.pipeline_mode<synchronous>, transform_indices = @transform_3, window_bounds = array<i64: 512, 128>}, {pipeline_mode = #tpu.pipeline_mode<synchronous>, transform_indices = @transform_4, window_bounds = array<i64: 1, 128>}, {transform_indices = @transform_5, window_bounds = array<i64: 16, 128>}]} {
    %c0 = arith.constant 0 : index
    %c0_0 = arith.constant 0 : index
    %0 = vector.load %arg1[%c0, %c0_0] : memref<16x128xf32, #tpu.memory_space<vmem>>, vector<16x128xf32>
    %c0_1 = arith.constant 0 : index
    %c0_2 = arith.constant 0 : index
    %1 = vector.load %arg2[%c0_1, %c0_2] : memref<128x512xf32, #tpu.memory_space<vmem>>, vector<128x512xf32>
    %cst = arith.constant dense<0.000000e+00> : vector<16x512xf32>
    %2 = tpu.matmul %0, %1, %cst {dimension_numbers = #tpu.dot_dimension_numbers<[1], [0], [0], [1], [0, 0, 1, 1], [], []>} : vector<16x128xf32>, vector<128x512xf32>, vector<16x512xf32> -> vector<16x512xf32>
    %c0_3 = arith.constant 0 : index
    %c0_4 = arith.constant 0 : index
    %3 = vector.load %arg3[%c0_3, %c0_4] : memref<1x512xf32, #tpu.memory_space<vmem>>, vector<1x512xf32>
    %4 = vector.broadcast %3 : vector<1x512xf32> to vector<16x512xf32>
    %5 = arith.addf %2, %4 : vector<16x512xf32>
    %cst_5 = arith.constant 5.000000e-01 : f32
    %6 = vector.broadcast %cst_5 : f32 to vector<16x512xf32>
    %7 = arith.mulf %6, %5 : vector<16x512xf32>
    %cst_6 = arith.constant 0.707106769 : f32
    %8 = vector.broadcast %cst_6 : f32 to vector<16x512xf32>
    %9 = arith.mulf %5, %8 : vector<16x512xf32>
    %10 = math.erf %9 : vector<16x512xf32>
    %cst_7 = arith.constant 1.000000e+00 : f32
    %11 = vector.broadcast %cst_7 : f32 to vector<16x512xf32>
    %12 = arith.addf %11, %10 : vector<16x512xf32>
    %13 = arith.mulf %7, %12 : vector<16x512xf32>
    %c0_8 = arith.constant 0 : index
    %c0_9 = arith.constant 0 : index
    %14 = vector.load %arg4[%c0_8, %c0_9] : memref<512x128xf32, #tpu.memory_space<vmem>>, vector<512x128xf32>
    %cst_10 = arith.constant dense<0.000000e+00> : vector<16x128xf32>
    %15 = tpu.matmul %13, %14, %cst_10 {dimension_numbers = #tpu.dot_dimension_numbers<[1], [0], [0], [1], [0, 0, 1, 1], [], []>} : vector<16x512xf32>, vector<512x128xf32>, vector<16x128xf32> -> vector<16x128xf32>
    %c0_11 = arith.constant 0 : index
    %c0_12 = arith.constant 0 : index
    %16 = vector.load %arg5[%c0_11, %c0_12] : memref<1x128xf32, #tpu.memory_space<vmem>>, vector<1x128xf32>
    %17 = vector.broadcast %16 : vector<1x128xf32> to vector<16x128xf32>
    %18 = arith.addf %15, %17 : vector<16x128xf32>
    %c0_13 = arith.constant 0 : index
    %c0_14 = arith.constant 0 : index
    %19 = vector.load %arg6[%c0_13, %c0_14] : memref<16x128xf32, #tpu.memory_space<vmem>>, vector<16x128xf32>
    tpu.vector_store %arg6[%c0_13, %c0_14], %18 {strides = array<i32>} : memref<16x128xf32, #tpu.memory_space<vmem>>, vector<16x128xf32>,
    return
  }
  func.func @transform_0(%arg0: i32) -> (i32, i32) {
    %c0_i32 = arith.constant 0 : i32
    %c0_i32_0 = arith.constant 0 : i32
    return %arg0, %c0_i32 : i32, i32
  }
  func.func @transform_1(%arg0: i32) -> (i32, i32) {
    %c0_i32 = arith.constant 0 : i32
    %c0_i32_0 = arith.constant 0 : i32
    %c0_i32_1 = arith.constant 0 : i32
    return %c0_i32, %c0_i32_0 : i32, i32
  }
  func.func @transform_2(%arg0: i32) -> (i32, i32) {
    %c0_i32 = arith.constant 0 : i32
    %c0_i32_0 = arith.constant 0 : i32
    %c0_i32_1 = arith.constant 0 : i32
    return %c0_i32, %c0_i32_0 : i32, i32
  }
  func.func @transform_3(%arg0: i32) -> (i32, i32) {
    %c0_i32 = arith.constant 0 : i32
    %c0_i32_0 = arith.constant 0 : i32
    %c0_i32_1 = arith.constant 0 : i32
    return %c0_i32, %c0_i32_0 : i32, i32
  }
  func.func @transform_4(%arg0: i32) -> (i32, i32) {
    %c0_i32 = arith.constant 0 : i32
    %c0_i32_0 = arith.constant 0 : i32
    %c0_i32_1 = arith.constant 0 : i32
    return %c0_i32, %c0_i32_0 : i32, i32
  }
  func.func @transform_5(%arg0: i32) -> (i32, i32) {
    %c0_i32 = arith.constant 0 : i32
    %c0_i32_0 = arith.constant 0 : i32
    return %arg0, %c0_i32 : i32, i32
  }
}

</mosaic_0001>

<bundles_post_ra>
// kernel: mlp_pallas.1
= control target key start
LH: loop header
LB: loop body
LE: loop exit
PB: predicated region body
PF: predicated region fallthrough
CT: control target
= control target key end

     0   :  { %10 = vsyncpa [#allocation3], 0  ;;  %s1015_s0 = inlined_call_operand.hbm [shape: f32[16,128], index: 0, kind: input, shape index: {}]   ;;  %s1016_s1 = inlined_call_operand.hbm [shape: f32[128,512], index: 1, kind: input, shape index: {}]   ;;  %s1017_s2 = inlined_call_operand.vmem [shape: f32[1,512], index: 2, kind: input, shape index: {}]   ;;  %s1018_s3 = inlined_call_operand.hbm [shape: f32[512,128], index: 3, kind: input, shape index: {}]   ;;  %s1019_s4 = inlined_call_operand.vmem [shape: f32[1,128], index: 4, kind: input, shape index: {}]   ;;  %s1020_s5 = inlined_call_operand.hbm [shape: f32[16,128], index: 5, kind: output, shape index: {}]  }
   0x1   :  { %11 = vsyncpa [#allocation6], 0 }
   0x2   :  { %12 = vsyncpa [#allocation4], 0  ;;  %s909_s18 = smov [#allocation5]   ;;  %s815_s22 = scalar_lea.hbm %s1016_s1, 8192 }
   0x3   :  { %s30_s19 = sshll.u32 %s909_s18, 4  ;;  %p816_p0 = scmp.ne.s32.totalorder %s1016_s1, %s815_s22  ;;  %s31_s19 = int_to_ptr.vmem [resolvable:$true] %s30_s19 }
   0x4   :  { %p819_p1 = scmp.lt.u32.totalorder %s815_s22, %s1016_s1 }
   0x6   :  { %p821_p2 = pnand %p819_p1, %p816_p0 }
   0x8   :  { %824 = shalt.err (!%p821_p2)
}
   0x9   :  { %s825_s27 = scalar_lea.vmem %s31_s19, 8192  ;;  %p830_p4 = scmp.lt.s32.totalorder %s31_s19, %s31_s19 }
   0xa   :  { %p826_p3 = scmp.ne.s32.totalorder %s31_s19, %s825_s27  ;;  %p831_p5 = scmp.lt.s32.totalorder %s825_s27, %s825_s27 }
   0xc   :  { %p832_p6 = por %p831_p5, %p830_p4 }
   0xe   :  { %p833_p7 = pnand %p832_p6, %p826_p3 }
  0x10   :  { %836 = shalt.err (!%p833_p7)
}
  0x11   :  { %s910_s28 = smov 512   ;;  %s911_s29 = smov 32  }
  0x12   :  { %36 = dma.hbm_to_vmem [thread:$0]  %s1016_s1, 8192, %s31_s19, [#allocation6], %s910_s28, %s910_s28, %s911_s29  }
  0x13   :  { %s912_s7 = smov [#allocation2]   ;;  %s837_s11 = scalar_lea.hbm %s1015_s0, 256 }
  0x14   :  { %s18_s8 = sshll.u32 %s912_s7, 4  ;;  %p838_p8 = scmp.ne.s32.totalorder %s1015_s0, %s837_s11  ;;  %s19_s8 = int_to_ptr.vmem [resolvable:$true] %s18_s8 }
  0x15   :  { %p841_p9 = scmp.lt.u32.totalorder %s837_s11, %s1015_s0 }
  0x17   :  { %p843_p10 = pnand %p841_p9, %p838_p8 }
  0x19   :  { %846 = shalt.err (!%p843_p10)
}
  0x1a   :  { %s847_s16 = scalar_lea.vmem %s19_s8, 256  ;;  %p852_p12 = scmp.lt.s32.totalorder %s19_s8, %s19_s8 }
  0x1b   :  { %p848_p11 = scmp.ne.s32.totalorder %s19_s8, %s847_s16  ;;  %p853_p13 = scmp.lt.s32.totalorder %s847_s16, %s847_s16 }
  0x1d   :  { %p854_p0 = por %p853_p13, %p852_p12 }
  0x1f   :  { %p855_p1 = pnand %p854_p0, %p848_p11 }
  0x21   :  { %858 = shalt.err (!%p855_p1)
}
  0x22   :  { %s913_s1 = smov 128   ;;  %s914_s17 = smov 8  }
  0x23   :  { %24 = dma.hbm_to_vmem [thread:$0]  %s1015_s0, 256, %s19_s8, [#allocation3], %s913_s1, %s913_s1, %s914_s17  }
  0x24   :  { %s915_s20 = smov [#allocation7]   ;;  %s859_s24 = scalar_lea.hbm %s1018_s3, 8192 }
  0x25   :  { %s44_s21 = sshll.u32 %s915_s20, 4  ;;  %p860_p2 = scmp.ne.s32.totalorder %s1018_s3, %s859_s24  ;;  %s45_s21 = int_to_ptr.vmem [resolvable:$true] %s44_s21 }
  0x26   :  { %p863_p3 = scmp.lt.u32.totalorder %s859_s24, %s1018_s3 }
  0x28   :  { %p865_p4 = pnand %p863_p3, %p860_p2 }
  0x2a   :  { %868 = shalt.err (!%p865_p4)
}
  0x2b   :  { %s869_s29 = scalar_lea.vmem %s45_s21, 8192  ;;  %p874_p6 = scmp.lt.s32.totalorder %s45_s21, %s45_s21 }
  0x2c   :  { %p870_p5 = scmp.ne.s32.totalorder %s45_s21, %s869_s29  ;;  %p875_p7 = scmp.lt.s32.totalorder %s869_s29, %s869_s29 }
  0x2e   :  { %p876_p8 = por %p875_p7, %p874_p6 }
  0x30   :  { %p877_p9 = pnand %p876_p8, %p870_p5 }
  0x32   :  { %880 = shalt.err (!%p877_p9)
}
  0x33   :  { %50 = dma.hbm_to_vmem [thread:$0]  %s1018_s3, 8192, %s45_s21, [#allocation6], %s913_s1, %s913_s1, %s914_s17  }
  0x34   :  { %903 = dma.done.wait [#allocation3], 256  }
  0x35   :  { %904 = vsyncadd [#allocation3], 4294967040 }
  0x36   :  { %905 = dma.done.wait [#allocation6], 16384  }
  0x37   :  { %906 = vsyncadd [#allocation6], 4294950912  ;;  %v916_v0 = vmov 0.0   ;;  %v65_v1 = vld [vmem:[#allocation5 + $0x8] sm:$0xff]  ;;  %v67_v3 = vld [vmem:[#allocation5 + $0x18] sm:$0xff]  ;;  %s917_s8 = smov [#allocation8]  }
  0x38   :  { %214 = vmatprep.mubr.f32.mxu0 %v916_v0  ;;  %291 = vmatprep.mubr.f32.mxu1 %v916_v0  ;;  %v69_v2 = vld [vmem:[#allocation5 + $0x28] sm:$0xff]  ;;  %v71_v5 = vld [vmem:[#allocation5 + $0x38] sm:$0xff]  ;;  %v64_v6 = vld [vmem:[#allocation5] sm:$0xff]  ;;  %s572_s9 = sshll.u32 %s917_s8, 4  ;;  %s573_s9 = int_to_ptr.vmem [resolvable:$true] %s572_s9 }
  0x39   :  { %v662_v4 = vpack.c.bf16 %v69_v2, %v65_v1  ;;  %v68_v7 = vld [vmem:[#allocation5 + $0x20] sm:$0xff]  ;;  %v694_v8 = vpack.c.bf16 %v71_v5, %v67_v3  ;;  %v66_v10 = vld [vmem:[#allocation5 + $0x10] sm:$0xff]  ;;  %v73_v12 = vld [vmem:[#allocation5 + $0x48] sm:$0xff]  ;;  %p886_p11 = scmp.lt.s32.totalorder %s573_s9, %s573_s9 }
  0x3a   :  { %v664_v9 = vpack.c.bf16 %v68_v7, %v64_v6  ;;  %v70_v11 = vld [vmem:[#allocation5 + $0x30] sm:$0xff]  ;;  %v77_v14 = vld [vmem:[#allocation5 + $0x68] sm:$0xff]  ;;  %v75_v15 = vld [vmem:[#allocation5 + $0x58] sm:$0xff] }
  0x3b   :  { %663 = vmatprep.subr.bf16.mxu0 %v662_v4  ;;  %v696_v13 = vpack.c.bf16 %v70_v11, %v66_v10  ;;  %v79_v16 = vld [vmem:[#allocation5 + $0x78] sm:$0xff]  ;;  %695 = vmatprep.subr.bf16.mxu1 %v694_v8  ;;  %v666_v17 = vpack.c.bf16 %v77_v14, %v73_v12  ;;  %v72_v19 = vld [vmem:[#allocation5 + $0x40] sm:$0xff]  ;;  %v74_v21 = vld [vmem:[#allocation5 + $0x50] sm:$0xff] }
  0x3c   :  { %665 = vmatpush1.bf16.msra.mxu0 %v664_v9  ;;  %v698_v18 = vpack.c.bf16 %v79_v16, %v75_v15  ;;  %v76_v20 = vld [vmem:[#allocation5 + $0x60] sm:$0xff]  ;;  %v78_v23 = vld [vmem:[#allocation5 + $0x70] sm:$0xff]  ;;  %v81_v24 = vld [vmem:[#allocation5 + $0x88] sm:$0xff] }
  0x3d   :  { %697 = vmatpush1.bf16.msra.mxu1 %v696_v13  ;;  %v668_v22 = vpack.c.bf16 %v76_v20, %v72_v19  ;;  %v85_v25 = vld [vmem:[#allocation5 + $0xa8] sm:$0xff]  ;;  %667 = vmatprep.subr.bf16.mxu0 %v666_v17  ;;  %v700_v26 = vpack.c.bf16 %v78_v23, %v74_v21  ;;  %v83_v28 = vld [vmem:[#allocation5 + $0x98] sm:$0xff]  ;;  %v80_v30 = vld [vmem:[#allocation5 + $0x80] sm:$0xff] }
  0x3e   :  { %699 = vmatprep.subr.bf16.mxu1 %v698_v18  ;;  %v670_v27 = vpack.c.bf16 %v85_v25, %v81_v24  ;;  %v87_v29 = vld [vmem:[#allocation5 + $0xb8] sm:$0xff]  ;;  %v84_v32 = vld [vmem:[#allocation5 + $0xa0] sm:$0xff]  ;;  %v82_v33 = vld [vmem:[#allocation5 + $0x90] sm:$0xff] }
  0x3f   :  { %v702_v31 = vpack.c.bf16 %v87_v29, %v83_v28  ;;  %v86_v34 = vld [vmem:[#allocation5 + $0xb0] sm:$0xff]  ;;  %v672_v35 = vpack.c.bf16 %v84_v32, %v80_v30  ;;  %v89_v36 = vld [vmem:[#allocation5 + $0xc8] sm:$0xff]  ;;  %v91_v38 = vld [vmem:[#allocation5 + $0xd8] sm:$0xff] }
  0x40   :  { %669 = vmatpush1.bf16.msra.mxu0 %v668_v22  ;;  %v93_v37 = vld [vmem:[#allocation5 + $0xe8] sm:$0xff]  ;;  %v704_v39 = vpack.c.bf16 %v86_v34, %v82_v33  ;;  %v95_v41 = vld [vmem:[#allocation5 + $0xf8] sm:$0xff]  ;;  %v88_v42 = vld [vmem:[#allocation5 + $0xc0] sm:$0xff] }
  0x41   :  { %701 = vmatpush1.bf16.msra.mxu1 %v700_v26  ;;  %671 = vmatprep.subr.bf16.mxu0 %v670_v27  ;;  %v674_v40 = vpack.c.bf16 %v93_v37, %v89_v36  ;;  %v92_v43 = vld [vmem:[#allocation5 + $0xe0] sm:$0xff]  ;;  %v706_v44 = vpack.c.bf16 %v95_v41, %v91_v38  ;;  %v90_v45 = vld [vmem:[#allocation5 + $0xd0] sm:$0xff]  ;;  %v97_v47 = vld [vmem:[#allocation5 + $0x108] sm:$0xff] }
  0x42   :  { %703 = vmatprep.subr.bf16.mxu1 %v702_v31  ;;  %v94_v46 = vld [vmem:[#allocation5 + $0xf0] sm:$0xff]  ;;  %v101_v48 = vld [vmem:[#allocation5 + $0x128] sm:$0xff]  ;;  %v99_v49 = vld [vmem:[#allocation5 + $0x118] sm:$0xff]  ;;  %v676_v51 = vpack.c.bf16 %v92_v43, %v88_v42 }
  0x43   :  { %v103_v50 = vld [vmem:[#allocation5 + $0x138] sm:$0xff]  ;;  %v708_v52 = vpack.c.bf16 %v94_v46, %v90_v45  ;;  %v678_v53 = vpack.c.bf16 %v101_v48, %v97_v47  ;;  %v96_v54 = vld [vmem:[#allocation5 + $0x100] sm:$0xff]  ;;  %v98_v56 = vld [vmem:[#allocation5 + $0x110] sm:$0xff] }
  0x44   :  { %673 = vmatpush1.bf16.msra.mxu0 %v672_v35  ;;  %v100_v55 = vld [vmem:[#allocation5 + $0x120] sm:$0xff]  ;;  %v710_v57 = vpack.c.bf16 %v103_v50, %v99_v49  ;;  %v102_v58 = vld [vmem:[#allocation5 + $0x130] sm:$0xff]  ;;  %v105_v59 = vld [vmem:[#allocation5 + $0x148] sm:$0xff] }
  0x45   :  { %705 = vmatpush1.bf16.msra.mxu1 %v704_v39  ;;  %675 = vmatprep.subr.bf16.mxu0 %v674_v40  ;;  %v109_v60 = vld [vmem:[#allocation5 + $0x168] sm:$0xff]  ;;  %v107_v61 = vld [vmem:[#allocation5 + $0x158] sm:$0xff]  ;;  %v680_v63 = vpack.c.bf16 %v100_v55, %v96_v54  ;;  %v712_v1 = vpack.c.bf16 %v102_v58, %v98_v56  ;;  %v104_v3 = vld [vmem:[#allocation5 + $0x140] sm:$0xff] }
  0x46   :  { %707 = vmatprep.subr.bf16.mxu1 %v706_v44  ;;  %v111_v62 = vld [vmem:[#allocation5 + $0x178] sm:$0xff]  ;;  %v682_v2 = vpack.c.bf16 %v109_v60, %v105_v59  ;;  %v108_v4 = vld [vmem:[#allocation5 + $0x160] sm:$0xff]  ;;  %v106_v5 = vld [vmem:[#allocation5 + $0x150] sm:$0xff] }
  0x47   :  { %v714_v6 = vpack.c.bf16 %v111_v62, %v107_v61  ;;  %v110_v7 = vld [vmem:[#allocation5 + $0x170] sm:$0xff]  ;;  %v113_v8 = vld [vmem:[#allocation5 + $0x188] sm:$0xff]  ;;  %v115_v10 = vld [vmem:[#allocation5 + $0x198] sm:$0xff]  ;;  %v684_v12 = vpack.c.bf16 %v108_v4, %v104_v3 }
  0x48   :  { %677 = vmatpush1.bf16.msra.mxu0 %v676_v51  ;;  %v117_v9 = vld [vmem:[#allocation5 + $0x1a8] sm:$0xff]  ;;  %v119_v11 = vld [vmem:[#allocation5 + $0x1b8] sm:$0xff]  ;;  %v716_v13 = vpack.c.bf16 %v110_v7, %v106_v5  ;;  %v112_v15 = vld [vmem:[#allocation5 + $0x180] sm:$0xff] }
  0x49   :  { %709 = vmatpush1.bf16.msra.mxu1 %v708_v52  ;;  %679 = vmatprep.subr.bf16.mxu0 %v678_v53  ;;  %v686_v14 = vpack.c.bf16 %v117_v9, %v113_v8  ;;  %v116_v16 = vld [vmem:[#allocation5 + $0x1a0] sm:$0xff]  ;;  %v114_v17 = vld [vmem:[#allocation5 + $0x190] sm:$0xff]  ;;  %v718_v18 = vpack.c.bf16 %v119_v11, %v115_v10  ;;  %v121_v20 = vld [vmem:[#allocation5 + $0x1c8] sm:$0xff] }
  0x4a   :  { %711 = vmatprep.subr.bf16.mxu1 %v710_v57  ;;  %v118_v19 = vld [vmem:[#allocation5 + $0x1b0] sm:$0xff]  ;;  %v125_v21 = vld [vmem:[#allocation5 + $0x1e8] sm:$0xff]  ;;  %v123_v22 = vld [vmem:[#allocation5 + $0x1d8] sm:$0xff]  ;;  %v688_v24 = vpack.c.bf16 %v116_v16, %v112_v15 }
  0x4b   :  { %v127_v23 = vld [vmem:[#allocation5 + $0x1f8] sm:$0xff]  ;;  %v720_v25 = vpack.c.bf16 %v118_v19, %v114_v17  ;;  %v690_v26 = vpack.c.bf16 %v125_v21, %v121_v20  ;;  %v120_v27 = vld [vmem:[#allocation5 + $0x1c0] sm:$0xff]  ;;  %v122_v29 = vld [vmem:[#allocation5 + $0x1d0] sm:$0xff] }
  0x4c   :  { %681 = vmatpush1.bf16.msra.mxu0 %v680_v63  ;;  %v124_v28 = vld [vmem:[#allocation5 + $0x1e0] sm:$0xff]  ;;  %v722_v30 = vpack.c.bf16 %v127_v23, %v123_v22  ;;  %v126_v31 = vld [vmem:[#allocation5 + $0x1f0] sm:$0xff]  ;;  %v361_v33 = vld [vmem:[#allocation7 + $0x88] sm:$0xff] }
  0x4d   :  { %713 = vmatpush1.bf16.msra.mxu1 %v712_v1  ;;  %683 = vmatprep.subr.bf16.mxu0 %v682_v2  ;;  %v360_v32 = vld [vmem:[#allocation7 + $0x80] sm:$0xff]  ;;  %v393_v35 = vld [vmem:[#allocation7 + $0x188] sm:$0xff]  ;;  %v692_v36 = vpack.c.bf16 %v124_v28, %v120_v27  ;;  %v724_v37 = vpack.c.bf16 %v126_v31, %v122_v29  ;;  %v362_v44 = vld [vmem:[#allocation7 + $0x90] sm:$0xff] }
  0x4e   :  { %715 = vmatprep.subr.bf16.mxu1 %v714_v6  ;;  %v392_v34 = vld [vmem:[#allocation7 + $0x180] sm:$0xff]  ;;  %v726_v38 = vpack.c.bf16 %v361_v33, %v360_v32  ;;  %v345_v41 = vld [vmem:[#allocation7 + $0x8] sm:$0xff]  ;;  %v363_v45 = vld [vmem:[#allocation7 + $0x98] sm:$0xff] }
  0x4f   :  { %v758_v39 = vpack.c.bf16 %v393_v35, %v392_v34  ;;  %v344_v40 = vld [vmem:[#allocation7] sm:$0xff]  ;;  %v377_v43 = vld [vmem:[#allocation7 + $0x108] sm:$0xff]  ;;  %v62_v46 = vld [vmem:[#allocation2] sm:$0xff]  ;;  %v730_v51 = vpack.c.bf16 %v363_v45, %v362_v44 }
  0x50   :  { %685 = vmatpush1.bf16.msra.mxu0 %v684_v12  ;;  %v376_v42 = vld [vmem:[#allocation7 + $0x100] sm:$0xff]  ;;  %v394_v47 = vld [vmem:[#allocation7 + $0x190] sm:$0xff]  ;;  %v395_v48 = vld [vmem:[#allocation7 + $0x198] sm:$0xff]  ;;  %v728_v49 = vpack.c.bf16 %v345_v41, %v344_v40 }
  0x51   :  { %717 = vmatpush1.bf16.msra.mxu1 %v716_v13  ;;  %687 = vmatprep.subr.bf16.mxu0 %v686_v14  ;;  %v760_v50 = vpack.c.bf16 %v377_v43, %v376_v42  ;;  %v346_v52 = vld [vmem:[#allocation7 + $0x10] sm:$0xff]  ;;  %v347_v53 = vld [vmem:[#allocation7 + $0x18] sm:$0xff]  ;;  %v762_v55 = vpack.c.bf16 %v395_v48, %v394_v47  ;;  %v364_v57 = vld [vmem:[#allocation7 + $0xa0] sm:$0xff] }
  0x52   :  { %719 = vmatprep.subr.bf16.mxu1 %v718_v18  ;;  %v378_v54 = vld [vmem:[#allocation7 + $0x110] sm:$0xff]  ;;  %v379_v56 = vld [vmem:[#allocation7 + $0x118] sm:$0xff]  ;;  %v365_v58 = vld [vmem:[#allocation7 + $0xa8] sm:$0xff]  ;;  %v732_v62 = vpack.c.bf16 %v347_v53, %v346_v52 }
  0x53   :  { %v63_v59 = vld [vmem:[#allocation2 + $0x8] sm:$0xff]  ;;  %v396_v60 = vld [vmem:[#allocation7 + $0x1a0] sm:$0xff]  ;;  %v397_v61 = vld [vmem:[#allocation7 + $0x1a8] sm:$0xff]  ;;  %v764_v63 = vpack.c.bf16 %v379_v56, %v378_v54  ;;  %v734_v1 = vpack.c.bf16 %v365_v58, %v364_v57 }
  0x54   :  { %689 = vmatpush1.bf16.msra.mxu0 %v688_v24  ;;  %v348_v2 = vld [vmem:[#allocation7 + $0x20] sm:$0xff]  ;;  %v349_v3 = vld [vmem:[#allocation7 + $0x28] sm:$0xff]  ;;  %v766_v4 = vpack.c.bf16 %v397_v61, %v396_v60  ;;  %v367_v9 = vld [vmem:[#allocation7 + $0xb8] sm:$0xff] }
  0x55   :  { %721 = vmatpush1.bf16.msra.mxu1 %v720_v25  ;;  %691 = vmatprep.subr.bf16.mxu0 %v690_v26  ;;  %v380_v5 = vld [vmem:[#allocation7 + $0x120] sm:$0xff]  ;;  %v381_v6 = vld [vmem:[#allocation7 + $0x128] sm:$0xff]  ;;  %v736_v7 = vpack.c.bf16 %v349_v3, %v348_v2  ;;  %v398_v10 = vld [vmem:[#allocation7 + $0x1b0] sm:$0xff] }
  0x56   :  { %723 = vmatprep.subr.bf16.mxu1 %v722_v30  ;;  %v768_v8 = vpack.c.bf16 %v381_v6, %v380_v5  ;;  %v399_v12 = vld [vmem:[#allocation7 + $0x1b8] sm:$0xff]  ;;  %v350_v13 = vld [vmem:[#allocation7 + $0x30] sm:$0xff]  ;;  %v368_v20 = vld [vmem:[#allocation7 + $0xc0] sm:$0xff]  ;;  %v130_v5 = vlaneseq }
  0x57   :  { %v351_v14 = vld [vmem:[#allocation7 + $0x38] sm:$0xff]  ;;  %v770_v15 = vpack.c.bf16 %v399_v12, %v398_v10  ;;  %v382_v17 = vld [vmem:[#allocation7 + $0x130] sm:$0xff]  ;;  %v369_v21 = vld [vmem:[#allocation7 + $0xc8] sm:$0xff] }
  0x58   :  { %693 = vmatpush1.bf16.msra.mxu0 %v692_v36  ;;  %v740_v16 = vpack.c.bf16 %v351_v14, %v350_v13  ;;  %v383_v18 = vld [vmem:[#allocation7 + $0x138] sm:$0xff]  ;;  %v400_v22 = vld [vmem:[#allocation7 + $0x1c0] sm:$0xff]  ;;  %v742_v23 = vpack.c.bf16 %v369_v21, %v368_v20  ;;  %v401_v24 = vld [vmem:[#allocation7 + $0x1c8] sm:$0xff]  ;;  %v131_v6 = vshrl.u32 %v130_v5, 7 }
  0x59   :  { %725 = vmatpush1.bf16.msra.mxu1 %v724_v37  ;;  %727 = vmatprep.subr.bf16.mxu0 %v726_v38  ;;  %v772_v19 = vpack.c.bf16 %v383_v18, %v382_v17  ;;  %v352_v25 = vld [vmem:[#allocation7 + $0x40] sm:$0xff]  ;;  %v353_v26 = vld [vmem:[#allocation7 + $0x48] sm:$0xff]  ;;  %v774_v27 = vpack.c.bf16 %v401_v24, %v400_v22  ;;  %v370_v32 = vld [vmem:[#allocation7 + $0xd0] sm:$0xff] }
  0x5a   :  { %759 = vmatprep.subr.bf16.mxu1 %v758_v39  ;;  %v744_v28 = vpack.c.bf16 %v353_v26, %v352_v25  ;;  %v384_v29 = vld [vmem:[#allocation7 + $0x140] sm:$0xff]  ;;  %v385_v30 = vld [vmem:[#allocation7 + $0x148] sm:$0xff]  ;;  %v371_v33 = vld [vmem:[#allocation7 + $0xd8] sm:$0xff]  ;;  %v144_v10 = vsub.s32 3, %v131_v6 }
  0x5b   :  { %215 = vmatmul.mubr.f32.vlgmr.msra.gmra.mrb[0].mxu0 %v62_v46  ;;  %v776_v31 = vpack.c.bf16 %v385_v30, %v384_v29  ;;  %v402_v34 = vld [vmem:[#allocation7 + $0x1d0] sm:$0xff]  ;;  %v746_v35 = vpack.c.bf16 %v371_v33, %v370_v32  ;;  %v403_v36 = vld [vmem:[#allocation7 + $0x1d8] sm:$0xff]  ;;  %v372_v44 = vld [vmem:[#allocation7 + $0xe0] sm:$0xff] }
  0x5c   :  { %292 = vmatmul.mubr.f32.vlgmr.msra.gmra.mrb[0].mxu1 %v62_v46  ;;  %220 = vmatprep.mubr.f32.mxu0 %v916_v0  ;;  %v354_v37 = vld [vmem:[#allocation7 + $0x50] sm:$0xff]  ;;  %v355_v38 = vld [vmem:[#allocation7 + $0x58] sm:$0xff]  ;;  %v778_v39 = vpack.c.bf16 %v403_v36, %v402_v34  ;;  %v373_v45 = vld [vmem:[#allocation7 + $0xe8] sm:$0xff] }
  0x5d   :  { %297 = vmatprep.mubr.f32.mxu1 %v916_v0  ;;  %729 = vmatpush3.bf16.msra.mxu0 %v728_v49  ;;  %v366_v0 = vld [vmem:[#allocation7 + $0xb0] sm:$0xff]  ;;  %v748_v40 = vpack.c.bf16 %v355_v38, %v354_v37  ;;  %v387_v42 = vld [vmem:[#allocation7 + $0x158] sm:$0xff]  ;;  %v404_v46 = vld [vmem:[#allocation7 + $0x1e0] sm:$0xff]  ;;  %v750_v47 = vpack.c.bf16 %v373_v45, %v372_v44 }
  0x5e   :  { %761 = vmatpush3.bf16.msra.mxu1 %v760_v50  ;;  %731 = vmatprep.subr.bf16.mxu0 %v730_v51  ;;  %v738_v11 = vpack.c.bf16 %v367_v9, %v366_v0  ;;  %v386_v41 = vld [vmem:[#allocation7 + $0x150] sm:$0xff]  ;;  %v405_v48 = vld [vmem:[#allocation7 + $0x1e8] sm:$0xff]  ;;  %v356_v49 = vld [vmem:[#allocation7 + $0x60] sm:$0xff]  ;;  %v140_v0 = vsub.s32 2, %v131_v6  ;;  %v136_v9 = vsub.s32 1, %v131_v6 }
  0x5f   :  { %221 = vmatmul.mubr.f32.gmra.mrb[2].mxu0 %v63_v59  ;;  %763 = vmatprep.subr.bf16.mxu1 %v762_v55  ;;  %v780_v43 = vpack.c.bf16 %v387_v42, %v386_v41  ;;  %v357_v50 = vld [vmem:[#allocation7 + $0x68] sm:$0xff]  ;;  %v782_v51 = vpack.c.bf16 %v405_v48, %v404_v46  ;;  %v388_v53 = vld [vmem:[#allocation7 + $0x160] sm:$0xff]  ;;  %v374_v56 = vld [vmem:[#allocation7 + $0xf0] sm:$0xff] }
  0x60   :  { %298 = vmatmul.mubr.f32.gmra.mrb[2].mxu1 %v63_v59  ;;  %v752_v52 = vpack.c.bf16 %v357_v50, %v356_v49  ;;  %v389_v54 = vld [vmem:[#allocation7 + $0x168] sm:$0xff]  ;;  %v375_v57 = vld [vmem:[#allocation7 + $0xf8] sm:$0xff]  ;;  %v406_v58 = vld [vmem:[#allocation7 + $0x1f0] sm:$0xff] }
  0x61   :  { %733 = vmatpush3.bf16.msra.mxu0 %v732_v62  ;;  %v784_v55 = vpack.c.bf16 %v389_v54, %v388_v53  ;;  %v754_v59 = vpack.c.bf16 %v375_v57, %v374_v56  ;;  %v407_v60 = vld [vmem:[#allocation7 + $0x1f8] sm:$0xff]  ;;  %v358_v61 = vld [vmem:[#allocation7 + $0x70] sm:$0xff] }
  0x62   :  { %765 = vmatpush3.bf16.msra.mxu1 %v764_v63  ;;  %735 = vmatprep.subr.bf16.mxu0 %v734_v1  ;;  %v359_v62 = vld [vmem:[#allocation7 + $0x78] sm:$0xff]  ;;  %v786_v63 = vpack.c.bf16 %v407_v60, %v406_v58  ;;  %v390_v2 = vld [vmem:[#allocation7 + $0x170] sm:$0xff] }
  0x63   :  { %767 = vmatprep.subr.bf16.mxu1 %v766_v4  ;;  %v756_v1 = vpack.c.bf16 %v359_v62, %v358_v61  ;;  %v391_v3 = vld [vmem:[#allocation7 + $0x178] sm:$0xff] }
  0x64   :  { %v788_v4 = vpack.c.bf16 %v391_v3, %v390_v2 }
  0x65   :  { %737 = vmatpush3.bf16.msra.mxu0 %v736_v7  ;;  %v132_v7 = vsub.s32 0, %v131_v6 }
  0x66   :  { %769 = vmatpush3.bf16.msra.mxu1 %v768_v8  ;;  %739 = vmatprep.subr.bf16.mxu0 %v738_v11  ;;  %v128_v8 = vld [vmem:[%s1017_s2] sm:$0xf] }
  0x67   :  { %771 = vmatprep.subr.bf16.mxu1 %v770_v15  ;;  %v133_v11 = vrot.slane %v128_v8, %v132_v7  ;;  %v141_v12 = vrot.slane %v128_v8, %v140_v0  ;;  %v137_v13 = vrot.slane %v128_v8, %v136_v9  ;;  %v145_v14 = vrot.slane %v128_v8, %v144_v10  ;;  %v585_v9 = vld [vmem:[%s1019_s4] ss:$0 sm:$0xff]  ;;  %s881_s4 = scalar_lea.vmem %s573_s9, 256 }
  0x68   :  { %p882_p10 = scmp.ne.s32.totalorder %s573_s9, %s881_s4  ;;  %p887_p12 = scmp.lt.s32.totalorder %s881_s4, %s881_s4 }
  0x69   :  { %741 = vmatpush3.bf16.msra.mxu0 %v740_v16 }
  0x6a   :  { %773 = vmatpush3.bf16.msra.mxu1 %v772_v19  ;;  %743 = vmatprep.subr.bf16.mxu0 %v742_v23  ;;  %p888_p13 = por %p887_p12, %p886_p11 }
  0x6b   :  { %775 = vmatprep.subr.bf16.mxu1 %v774_v27 }
  0x6c   :  { %p889_p0 = pnand %p888_p13, %p882_p10 }
  0x6d   :  { %745 = vmatpush3.bf16.msra.mxu0 %v744_v28 }
  0x6e   :  { %777 = vmatpush3.bf16.msra.mxu1 %v776_v31  ;;  %747 = vmatprep.subr.bf16.mxu0 %v746_v35 }
  0x6f   :  { %779 = vmatprep.subr.bf16.mxu1 %v778_v39 }
  0x71   :  { %749 = vmatpush3.bf16.msra.mxu0 %v748_v40 }
  0x72   :  { %781 = vmatpush3.bf16.msra.mxu1 %v780_v43  ;;  %751 = vmatprep.subr.bf16.mxu0 %v750_v47 }
  0x73   :  { %783 = vmatprep.subr.bf16.mxu1 %v782_v51 }
  0x75   :  { %753 = vmatpush3.bf16.msra.mxu0 %v752_v52 }
  0x76   :  { %785 = vmatpush3.bf16.msra.mxu1 %v784_v55  ;;  %755 = vmatprep.subr.bf16.mxu0 %v754_v59 }
  0x77   :  { %787 = vmatprep.subr.bf16.mxu1 %v786_v63 }
  0x79   :  { %757 = vmatpush3.bf16.msra.mxu0 %v756_v1 }
  0x7a   :  { %789 = vmatpush3.bf16.msra.mxu1 %v788_v4 }
 0x12e   :  { %v216_v15 = vpop.f32.mrb[0].mxu0 }
 0x12f   :  { %v217_v16 = vadd.f32 %v216_v15, %v133_v11  ;;  %v293_v17 = vpop.f32.mrb[0].mxu1  ;;  %v218_v18 = vpop.f32.mrb[1].mxu0 }
 0x130   :  { %v294_v19 = vadd.f32 %v293_v17, %v141_v12  ;;  %v219_v20 = vadd.f32 %v218_v18, %v137_v13  ;;  %v295_v21 = vpop.f32.mrb[1].mxu1 }
 0x131   :  { %v312_v22 = vmul.f32 0.70710677, %v217_v16  ;;  %v296_v23 = vadd.f32 %v295_v21, %v145_v14  ;;  %v304_v47 = vmul.f32 0.5, %v217_v16 }
 0x132   :  { %v314_v24 = vmul.f32 0.70710677, %v294_v19  ;;  %v313_v25 = vmul.f32 0.70710677, %v219_v20  ;;  %v222_v27 = vpop.f32.mrb[2].mxu0  ;;  %v305_v45 = vmul.f32 0.5, %v219_v20 }
 0x133   :  { %799 = verf.f32 %v312_v22  ;;  %v315_v26 = vmul.f32 0.70710677, %v296_v23  ;;  %v299_v28 = vpop.f32.mrb[2].mxu1  ;;  %v223_v29 = vadd.f32 %v222_v27, %v133_v11  ;;  %v224_v31 = vpop.f32.mrb[3].mxu0  ;;  %v307_v48 = vmul.f32 0.5, %v296_v23 }
 0x134   :  { %801 = verf.f32 %v314_v24  ;;  %v300_v30 = vadd.f32 %v299_v28, %v141_v12  ;;  %v301_v32 = vpop.f32.mrb[3].mxu1  ;;  %v225_v33 = vadd.f32 %v224_v31, %v137_v13  ;;  %v306_v51 = vmul.f32 0.5, %v294_v19 }
 0x135   :  { %803 = verf.f32 %v313_v25  ;;  %v302_v34 = vadd.f32 %v301_v32, %v145_v14  ;;  %v316_v35 = vmul.f32 0.70710677, %v223_v29  ;;  %v308_v63 = vmul.f32 0.5, %v223_v29 }
 0x136   :  { %805 = verf.f32 %v315_v26  ;;  %v318_v36 = vmul.f32 0.70710677, %v300_v30  ;;  %v317_v37 = vmul.f32 0.70710677, %v225_v33  ;;  %v309_v61 = vmul.f32 0.5, %v225_v33 }
 0x137   :  { %807 = verf.f32 %v316_v35  ;;  %v319_v38 = vmul.f32 0.70710677, %v302_v34  ;;  %v311_v1 = vmul.f32 0.5, %v302_v34  ;;  %v310_v3 = vmul.f32 0.5, %v300_v30 }
 0x138   :  { %809 = verf.f32 %v318_v36 }
 0x139   :  { %811 = verf.f32 %v317_v37 }
 0x13a   :  { %813 = verf.f32 %v319_v38 }
 0x13d   :  { %v800_v39 = vpop.eup %799 }
 0x13e   :  { %v802_v40 = vpop.eup %801  ;;  %v328_v42 = vadd.f32 1.0, %v800_v39 }
 0x13f   :  { %v804_v41 = vpop.eup %803  ;;  %v330_v44 = vadd.f32 1.0, %v802_v40 }
 0x140   :  { %v806_v43 = vpop.eup %805  ;;  %v329_v46 = vadd.f32 1.0, %v804_v41  ;;  %v336_v54 = vmul.f32 %v328_v42, %v304_v47 }
 0x141   :  { %v331_v49 = vadd.f32 1.0, %v806_v43  ;;  %v808_v50 = vpop.eup %807  ;;  %v338_v57 = vmul.f32 %v330_v44, %v306_v51 }
 0x142   :  { %v337_v52 = vmul.f32 %v329_v46, %v305_v45  ;;  %v810_v53 = vpop.eup %809  ;;  %v332_v58 = vadd.f32 1.0, %v808_v50 }
 0x143   :  { %v339_v55 = vmul.f32 %v331_v49, %v307_v48  ;;  %v812_v56 = vpop.eup %811  ;;  %v334_v60 = vadd.f32 1.0, %v810_v53 }
 0x144   :  { %479 = vmatprep.mubr.f32.mxu0 %v337_v52  ;;  %v814_v59 = vpop.eup %813  ;;  %v333_v62 = vadd.f32 1.0, %v812_v56  ;;  %v340_v6 = vmul.f32 %v332_v58, %v308_v63 }
 0x145   :  { %554 = vmatprep.mubr.f32.mxu1 %v339_v55  ;;  %480 = vmatmul.mubr.f32.vlgmr.msra.gmra.mrb[4].mxu0 %v336_v54  ;;  %v335_v2 = vadd.f32 1.0, %v814_v59  ;;  %v342_v7 = vmul.f32 %v334_v60, %v310_v3 }
 0x146   :  { %555 = vmatmul.mubr.f32.vlgmr.msra.gmra.mrb[4].mxu1 %v338_v57  ;;  %v341_v4 = vmul.f32 %v333_v62, %v309_v61 }
 0x147   :  { %v343_v5 = vmul.f32 %v335_v2, %v311_v1 }
 0x148   :  { %484 = vmatprep.mubr.f32.mxu0 %v341_v4 }
 0x149   :  { %559 = vmatprep.mubr.f32.mxu1 %v343_v5  ;;  %485 = vmatmul.mubr.f32.gmra.mrb[6].mxu0 %v340_v6 }
 0x14a   :  { %560 = vmatmul.mubr.f32.gmra.mrb[6].mxu1 %v342_v7 }
 0x218   :  { %v618_v8 = vpop.f32.mrb[4].mxu0 }
 0x219   :  { %v656_v0 = vpop.f32.mrb[4].mxu1  ;;  %v619_v10 = vpop.f32.mrb[5].mxu0 }
 0x21a   :  { %v620_v11 = vadd.f32 %v619_v10, %v618_v8  ;;  %v657_v12 = vpop.f32.mrb[5].mxu1 }
 0x21b   :  { %v658_v13 = vadd.f32 %v657_v12, %v656_v0 }
 0x21c   :  { %v482_v14 = vadd.f32 %v620_v11, %v585_v9  ;;  %v621_v15 = vpop.f32.mrb[6].mxu0 }
 0x21d   :  { %v659_v17 = vpop.f32.mrb[6].mxu1  ;;  %v622_v18 = vpop.f32.mrb[7].mxu0 }
 0x21e   :  { %v557_v16 = vadd.f32 %v658_v13, %v482_v14  ;;  %v623_v19 = vadd.f32 %v622_v18, %v621_v15  ;;  %v660_v20 = vpop.f32.mrb[7].mxu1 }
 0x21f   :  { %v661_v21 = vadd.f32 %v660_v20, %v659_v17 }
 0x220   :  { %565 = vst [vmem:[#allocation8] sm:$0xff] %v557_v16  ;;  %v487_v22 = vadd.f32 %v623_v19, %v585_v9 }
 0x222   :  { %v562_v23 = vadd.f32 %v661_v21, %v487_v22 }
 0x224   :  { %566 = vst [vmem:[#allocation8 + $0x8] sm:$0xff] %v562_v23 }
 0x225   :  { %892 = shalt.err (!%p889_p0)
}
 0x226   :  { %s893_s12 = scalar_lea.hbm %s1020_s5, 256 }
 0x227   :  { %p894_p1 = scmp.ne.s32.totalorder %s1020_s5, %s893_s12  ;;  %p897_p2 = scmp.lt.u32.totalorder %s893_s12, %s1020_s5 }
 0x229   :  { %p899_p3 = pnand %p897_p2, %p894_p1 }
 0x22b   :  { %902 = shalt.err (!%p899_p3)
}
 0x22c   :  { %578 = dma.vmem_to_hbm [thread:$0]  %s573_s9, 256, %s1020_s5, [#allocation4], %s913_s1, %s913_s1, %s914_s17  }
 0x22d   :  { %907 = dma.done.wait [#allocation4], 256  }
 0x22e   :  { %908 = vsyncadd [#allocation4], 4294967040 }
 0x22f   :  { %582 = vsyncpa [#allocation3], 1 }
 0x230   :  { %583 = vsyncpa [#allocation6], 1 }
 0x231   :  { %584 = vsyncpa [#allocation4], 1 }

</bundles_post_ra>
